<compile_context>
chip_gen: v6e
topology: v6e:2x2x1
jax: 0.10.0
libtpu: 0.0.40
codegen_flags: <defaults>
</compile_context>

<pallas_src>
import functools

import jax
import jax.numpy as jnp
from jax.experimental import pallas as pl
from jax.experimental.pallas import tpu as pltpu

IN_FEATURES = 784
H1, H2, NUM_CLASSES = 200, 80, 10
H1_PAD, H2_PAD, OUT_PAD = 256, 128, 128   # lane-aligned hidden / output widths
NEG_BIG = -1e30                           # bias for padded logit columns


def _round_up(n, m):
    return ((n + m - 1) // m) * m


def mlp_kernel(x_ref, w1_ref, b1_ref, w2_ref, b2_ref, w3_ref, b3_ref, o_ref):
    # in-kernel f32 -> bf16 cast (MXU-native inputs, f32 accumulation)
    x = x_ref[...].astype(jnp.bfloat16)
    # lin1 + relu
    h1 = jnp.dot(x, w1_ref[...], preferred_element_type=jnp.float32)
    h1 = jnp.maximum(h1 + b1_ref[...], 0.0).astype(jnp.bfloat16)
    # lin2 + relu
    h2 = jnp.dot(h1, w2_ref[...], preferred_element_type=jnp.float32)
    h2 = jnp.maximum(h2 + b2_ref[...], 0.0).astype(jnp.bfloat16)
    # lin3: padded columns (>= 10) carry bias -1e30 -> exp() underflows to 0 in the sum
    logits = jnp.dot(h2, w3_ref[...], preferred_element_type=jnp.float32) + b3_ref[...]
    # numerically stable log_softmax along the last axis (f32)
    m = jnp.max(logits, axis=-1, keepdims=True)
    shifted = logits - m
    lse = jnp.log(jnp.sum(jnp.exp(shifted), axis=-1, keepdims=True))
    # bf16 store halves output traffic; padded cols hold ~-1e30 and are sliced off.
    o_ref[...] = (shifted - lse).astype(o_ref.dtype)


def _prepare_params(params):
    """Pad output dims to lane multiples; weights -> bf16, biases stay f32.
    The contraction dim of w1 stays at 784 (Mosaic pads the VMEM layout internally)."""
    w1 = jnp.pad(params["w1"], ((0, 0), (0, H1_PAD - H1))).astype(jnp.bfloat16)
    b1 = jnp.pad(params["b1"], ((0, 0), (0, H1_PAD - H1)))
    w2 = jnp.pad(params["w2"], ((0, H1_PAD - H1), (0, H2_PAD - H2))).astype(jnp.bfloat16)
    b2 = jnp.pad(params["b2"], ((0, 0), (0, H2_PAD - H2)))
    w3 = jnp.pad(params["w3"], ((0, H2_PAD - H2), (0, OUT_PAD - NUM_CLASSES))).astype(jnp.bfloat16)
    b3 = jnp.pad(params["b3"], ((0, 0), (0, OUT_PAD - NUM_CLASSES)), constant_values=NEG_BIG)
    return w1, b1, w2, b2, w3, b3


def _choose_batch_tile(B, tb):
    """Rows per grid step: multiple of 16 (bf16 sublane packing); when the batch can be
    split, ensure >= 2 grid steps so both v7x TensorCores get work."""
    if B < 16:
        return B                               # single block equal to the (tiny) batch
    half = _round_up((B + 1) // 2, 16)
    return max(16, min(tb, half))


@functools.partial(jax.jit, static_argnames=("tb",))
def model_nn_forward(x, params, tb=1024):
    """x: (B, 784) float32; params: dict of (in,out) weights and (1,out) biases."""
    B = x.shape[0]
    TB = _choose_batch_tile(B, tb)
    grid = (pl.cdiv(B, TB),)                   # ragged last block allowed

    w1, b1, w2, b2, w3, b3 = _prepare_params(params)

    const = lambda i: (0, 0)                   # weights/biases resident across grid steps
    in_specs = [
        pl.BlockSpec((TB, IN_FEATURES), lambda i: (i, 0)),
        pl.BlockSpec((IN_FEATURES, H1_PAD), const),
        pl.BlockSpec((1, H1_PAD), const),
        pl.BlockSpec((H1_PAD, H2_PAD), const),
        pl.BlockSpec((1, H2_PAD), const),
        pl.BlockSpec((H2_PAD, OUT_PAD), const),
        pl.BlockSpec((1, OUT_PAD), const),
    ]
    out_spec = pl.BlockSpec((TB, OUT_PAD), lambda i: (i, 0))

    # VMEM budget: double-buffered x/out blocks + resident weights + compiler margin.
    w_bytes = (w1.size + w2.size + w3.size) * 2 + (b1.size + b2.size + b3.size) * 4
    vmem_limit = int(2 * (TB * IN_FEATURES * 4 + TB * OUT_PAD * 2) + 2 * w_bytes + (4 << 20))
    vmem_limit = min(max(vmem_limit, 32 << 20), 56 << 20)  # < v7x 64 MiB physical

    flops = 2 * B * (IN_FEATURES * H1 + H1 * H2 + H2 * NUM_CLASSES)
    bytes_accessed = B * IN_FEATURES * 4 + w_bytes + B * OUT_PAD * 2
    cost = pl.CostEstimate(flops=flops, transcendentals=B * (OUT_PAD + 1),
                           bytes_accessed=bytes_accessed)

    out = pl.pallas_call(
        mlp_kernel,
        out_shape=jax.ShapeDtypeStruct((B, OUT_PAD), jnp.bfloat16),
        grid=grid,
        in_specs=in_specs,
        out_specs=out_spec,
        compiler_params=pltpu.CompilerParams(
            dimension_semantics=("parallel",),
            vmem_limit_bytes=vmem_limit),
        cost_estimate=cost,
    )(x, w1, b1, w2, b2, w3, b3)

    return out[:, :NUM_CLASSES].astype(jnp.float32)


def init_params(key):
    """Deterministic synthetic init matching nn.Linear shapes (stored transposed, f32)."""
    ks = jax.random.split(key, 6)

    def lin(kw, kb, fan_in, fan_out):
        bound = 1.0 / jnp.sqrt(fan_in)
        w = jax.random.uniform(kw, (fan_in, fan_out), jnp.float32, -bound, bound)
        b = jax.random.uniform(kb, (1, fan_out), jnp.float32, -bound, bound)
        return w, b

    w1, b1 = lin(ks[0], ks[1], IN_FEATURES, H1)
    w2, b2 = lin(ks[2], ks[3], H1, H2)
    w3, b3 = lin(ks[4], ks[5], H2, NUM_CLASSES)
    return {"w1": w1, "b1": b1, "w2": w2, "b2": b2, "w3": w3, "b3": b3}


def reference_forward(x, p):
    h1 = jax.nn.relu(x @ p["w1"] + p["b1"])
    h2 = jax.nn.relu(h1 @ p["w2"] + p["b2"])
    logits = h2 @ p["w3"] + p["b3"]
    return jax.nn.log_softmax(logits, axis=1)


if __name__ == "__main__":
    key = jax.random.PRNGKey(0)
    k_x, k_p = jax.random.split(key)
    B = 8
    x = jax.random.normal(k_x, (B, IN_FEATURES), jnp.float32)
    params = init_params(k_p)

    out = model_nn_forward(x, params)
    out = jax.block_until_ready(out)

    ref = reference_forward(x, params)  # f32 reference; kernel uses bf16 matmul inputs/output
    assert out.shape == (B, NUM_CLASSES)
    assert jnp.allclose(out, ref, atol=3e-2, rtol=3e-2), float(jnp.max(jnp.abs(out - ref)))
    print("KERNEL_OK")
</pallas_src>

<mosaic_0001>
module attributes {stable_mosaic.version = 11 : i64} {
  func.func @mlp_kernel(%arg0: i32, %arg1: memref<8x784xf32, #tpu.memory_space<vmem>>, %arg2: memref<784x256xbf16, #tpu.memory_space<vmem>>, %arg3: memref<1x256xf32, #tpu.memory_space<vmem>>, %arg4: memref<256x128xbf16, #tpu.memory_space<vmem>>, %arg5: memref<1x128xf32, #tpu.memory_space<vmem>>, %arg6: memref<128x128xbf16, #tpu.memory_space<vmem>>, %arg7: memref<1x128xf32, #tpu.memory_space<vmem>>, %arg8: memref<8x128xbf16, #tpu.memory_space<vmem>>) attributes {dimension_semantics = [#tpu.dimension_semantics<parallel>], iteration_bounds = array<i64: 1>, scalar_prefetch = 0 : i64, scratch_operands = 0 : i64, tpu.core_type = #tpu.core_type<tc>, window_params = [{transform_indices = @transform_0, window_bounds = array<i64: 8, 784>}, {pipeline_mode = #tpu.pipeline_mode<synchronous>, transform_indices = @transform_1, window_bounds = array<i64: 784, 256>}, {pipeline_mode = #tpu.pipeline_mode<synchronous>, transform_indices = @transform_2, window_bounds = array<i64: 1, 256>}, {pipeline_mode = #tpu.pipeline_mode<synchronous>, transform_indices = @transform_3, window_bounds = array<i64: 256, 128>}, {pipeline_mode = #tpu.pipeline_mode<synchronous>, transform_indices = @transform_4, window_bounds = array<i64: 1, 128>}, {pipeline_mode = #tpu.pipeline_mode<synchronous>, transform_indices = @transform_5, window_bounds = array<i64: 128, 128>}, {pipeline_mode = #tpu.pipeline_mode<synchronous>, transform_indices = @transform_6, window_bounds = array<i64: 1, 128>}, {transform_indices = @transform_7, window_bounds = array<i64: 8, 128>}]} {
    %c0 = arith.constant 0 : index
    %c0_0 = arith.constant 0 : index
    %0 = vector.load %arg1[%c0, %c0_0] : memref<8x784xf32, #tpu.memory_space<vmem>>, vector<8x784xf32>
    %1 = arith.truncf %0 : vector<8x784xf32> to vector<8x784xbf16>
    %c0_1 = arith.constant 0 : index
    %c0_2 = arith.constant 0 : index
    %2 = vector.load %arg2[%c0_1, %c0_2] : memref<784x256xbf16, #tpu.memory_space<vmem>>, vector<784x256xbf16>
    %cst = arith.constant dense<0.000000e+00> : vector<8x256xf32>
    %3 = tpu.matmul %1, %2, %cst {dimension_numbers = #tpu.dot_dimension_numbers<[1], [0], [0], [1], [0, 0, 1, 1], [], []>} : vector<8x784xbf16>, vector<784x256xbf16>, vector<8x256xf32> -> vector<8x256xf32>
    %c0_3 = arith.constant 0 : index
    %c0_4 = arith.constant 0 : index
    %4 = vector.load %arg3[%c0_3, %c0_4] : memref<1x256xf32, #tpu.memory_space<vmem>>, vector<1x256xf32>
    %5 = vector.broadcast %4 : vector<1x256xf32> to vector<8x256xf32>
    %6 = arith.addf %3, %5 : vector<8x256xf32>
    %cst_5 = arith.constant 0.000000e+00 : f32
    %7 = vector.broadcast %cst_5 : f32 to vector<8x256xf32>
    %8 = arith.maximumf %6, %7 : vector<8x256xf32>
    %9 = arith.truncf %8 : vector<8x256xf32> to vector<8x256xbf16>
    %c0_6 = arith.constant 0 : index
    %c0_7 = arith.constant 0 : index
    %10 = vector.load %arg4[%c0_6, %c0_7] : memref<256x128xbf16, #tpu.memory_space<vmem>>, vector<256x128xbf16>
    %cst_8 = arith.constant dense<0.000000e+00> : vector<8x128xf32>
    %11 = tpu.matmul %9, %10, %cst_8 {dimension_numbers = #tpu.dot_dimension_numbers<[1], [0], [0], [1], [0, 0, 1, 1], [], []>} : vector<8x256xbf16>, vector<256x128xbf16>, vector<8x128xf32> -> vector<8x128xf32>
    %c0_9 = arith.constant 0 : index
    %c0_10 = arith.constant 0 : index
    %12 = vector.load %arg5[%c0_9, %c0_10] : memref<1x128xf32, #tpu.memory_space<vmem>>, vector<1x128xf32>
    %13 = vector.broadcast %12 : vector<1x128xf32> to vector<8x128xf32>
    %14 = arith.addf %11, %13 : vector<8x128xf32>
    %cst_11 = arith.constant 0.000000e+00 : f32
    %15 = vector.broadcast %cst_11 : f32 to vector<8x128xf32>
    %16 = arith.maximumf %14, %15 : vector<8x128xf32>
    %17 = arith.truncf %16 : vector<8x128xf32> to vector<8x128xbf16>
    %c0_12 = arith.constant 0 : index
    %c0_13 = arith.constant 0 : index
    %18 = vector.load %arg6[%c0_12, %c0_13] : memref<128x128xbf16, #tpu.memory_space<vmem>>, vector<128x128xbf16>
    %cst_14 = arith.constant dense<0.000000e+00> : vector<8x128xf32>
    %19 = tpu.matmul %17, %18, %cst_14 {dimension_numbers = #tpu.dot_dimension_numbers<[1], [0], [0], [1], [0, 0, 1, 1], [], []>} : vector<8x128xbf16>, vector<128x128xbf16>, vector<8x128xf32> -> vector<8x128xf32>
    %c0_15 = arith.constant 0 : index
    %c0_16 = arith.constant 0 : index
    %20 = vector.load %arg7[%c0_15, %c0_16] : memref<1x128xf32, #tpu.memory_space<vmem>>, vector<1x128xf32>
    %21 = vector.broadcast %20 : vector<1x128xf32> to vector<8x128xf32>
    %22 = arith.addf %19, %21 : vector<8x128xf32>
    %cst_17 = arith.constant dense<0xFF800000> : vector<8xf32>
    %23 = vector.multi_reduction <maximumf>, %22, %cst_17 [1] : vector<8x128xf32> to vector<8xf32>
    %24 = vector.shape_cast %23 : vector<8xf32> to vector<8x1xf32>
    %25 = vector.broadcast %24 : vector<8x1xf32> to vector<8x128xf32>
    %26 = arith.subf %22, %25 : vector<8x128xf32>
    %27 = math.exp %26 : vector<8x128xf32>
    %cst_18 = arith.constant dense<0.000000e+00> : vector<8xf32>
    %28 = vector.multi_reduction <add>, %27, %cst_18 [1] : vector<8x128xf32> to vector<8xf32>
    %29 = vector.shape_cast %28 : vector<8xf32> to vector<8x1xf32>
    %30 = math.log %29 : vector<8x1xf32>
    %31 = vector.broadcast %30 : vector<8x1xf32> to vector<8x128xf32>
    %32 = arith.subf %26, %31 : vector<8x128xf32>
    %33 = arith.truncf %32 : vector<8x128xf32> to vector<8x128xbf16>
    %c0_19 = arith.constant 0 : index
    %c0_20 = arith.constant 0 : index
    %34 = vector.load %arg8[%c0_19, %c0_20] : memref<8x128xbf16, #tpu.memory_space<vmem>>, vector<8x128xbf16>
    tpu.vector_store %arg8[%c0_19, %c0_20], %33 {strides = array<i32>} : memref<8x128xbf16, #tpu.memory_space<vmem>>, vector<8x128xbf16>,
    return
  }
  func.func @transform_0(%arg0: i32) -> (i32, i32) {
    %c0_i32 = arith.constant 0 : i32
    %c0_i32_0 = arith.constant 0 : i32
    return %arg0, %c0_i32 : i32, i32
  }
  func.func @transform_1(%arg0: i32) -> (i32, i32) {
    %c0_i32 = arith.constant 0 : i32
    %c0_i32_0 = arith.constant 0 : i32
    %c0_i32_1 = arith.constant 0 : i32
    return %c0_i32, %c0_i32_0 : i32, i32
  }
  func.func @transform_2(%arg0: i32) -> (i32, i32) {
    %c0_i32 = arith.constant 0 : i32
    %c0_i32_0 = arith.constant 0 : i32
    %c0_i32_1 = arith.constant 0 : i32
    return %c0_i32, %c0_i32_0 : i32, i32
  }
  func.func @transform_3(%arg0: i32) -> (i32, i32) {
    %c0_i32 = arith.constant 0 : i32
    %c0_i32_0 = arith.constant 0 : i32
    %c0_i32_1 = arith.constant 0 : i32
    return %c0_i32, %c0_i32_0 : i32, i32
  }
  func.func @transform_4(%arg0: i32) -> (i32, i32) {
    %c0_i32 = arith.constant 0 : i32
    %c0_i32_0 = arith.constant 0 : i32
    %c0_i32_1 = arith.constant 0 : i32
    return %c0_i32, %c0_i32_0 : i32, i32
  }
  func.func @transform_5(%arg0: i32) -> (i32, i32) {
    %c0_i32 = arith.constant 0 : i32
    %c0_i32_0 = arith.constant 0 : i32
    %c0_i32_1 = arith.constant 0 : i32
    return %c0_i32, %c0_i32_0 : i32, i32
  }
  func.func @transform_6(%arg0: i32) -> (i32, i32) {
    %c0_i32 = arith.constant 0 : i32
    %c0_i32_0 = arith.constant 0 : i32
    %c0_i32_1 = arith.constant 0 : i32
    return %c0_i32, %c0_i32_0 : i32, i32
  }
  func.func @transform_7(%arg0: i32) -> (i32, i32) {
    %c0_i32 = arith.constant 0 : i32
    %c0_i32_0 = arith.constant 0 : i32
    return %arg0, %c0_i32 : i32, i32
  }
}

</mosaic_0001>

<bundles_post_ra>
// kernel: model_nn_forward.1
= control target key start
LH: loop header
LB: loop body
LE: loop exit
PB: predicated region body
PF: predicated region fallthrough
CT: control target
= control target key end

     0   :  { %vm641_vm0 = vcmask 130048   ;;  %vm1473_vm1 = vmmov 0   ;;  %s1922_s1 = inlined_call_operand.vmem [shape: bf16[784,256], index: 1, kind: input, shape index: {}]   ;;  %s1923_s0 = inlined_call_operand.vmem [shape: f32[8,784], index: 0, kind: input, shape index: {}]   ;;  %s1924_s3 = inlined_call_operand.vmem [shape: bf16[256,128], index: 3, kind: input, shape index: {}]   ;;  %s1925_s5 = inlined_call_operand.vmem [shape: bf16[128,128], index: 5, kind: input, shape index: {}]   ;;  %s1926_s2 = inlined_call_operand.vmem [shape: f32[1,256], index: 2, kind: input, shape index: {}]   ;;  %s1927_s4 = inlined_call_operand.vmem [shape: f32[1,128], index: 4, kind: input, shape index: {}]   ;;  %s1928_s6 = inlined_call_operand.vmem [shape: f32[1,128], index: 6, kind: input, shape index: {}]   ;;  %s1929_s7 = inlined_call_operand.vmem [shape: bf16[8,128], index: 7, kind: output, shape index: {}]  }
   0x1   :  { %v1296_v0 = vld [vmem:[%s1922_s1 + $0x74] ss:$8 sps:$4 sm:$0xff]   ;;  %v1298_v1 = vld [vmem:[%s1922_s1 + $0x70] ss:$8 sps:$4 sm:$0xff]   ;;  %v1302_v4 = vld [vmem:[%s1922_s1 + $0x64] ss:$8 sps:$4 sm:$0xff]  }
   0x2   :  { %645 = vmatprep.subr.bf16.mxu0 %v1296_v0  ;;  %v1299_v2 = vld [vmem:[%s1922_s1 + $0x174] ss:$8 sps:$4 sm:$0xff]   ;;  %v1301_v3 = vld [vmem:[%s1922_s1 + $0x170] ss:$8 sps:$4 sm:$0xff]   ;;  %v1304_v5 = vld [vmem:[%s1922_s1 + $0x60] ss:$8 sps:$4 sm:$0xff]  }
   0x3   :  { %646 = vmatpush1.bf16.msra.mxu0 %v1298_v1  ;;  %686 = vmatprep.subr.bf16.mxu1 %v1299_v2  ;;  %v1305_v6 = vld [vmem:[%s1922_s1 + $0x164] ss:$8 sps:$4 sm:$0xff]   ;;  %v1307_v7 = vld [vmem:[%s1922_s1 + $0x160] ss:$8 sps:$4 sm:$0xff]   ;;  %v1308_v8 = vld [vmem:[%s1922_s1 + $0x54] ss:$8 sps:$4 sm:$0xff]  }
   0x4   :  { %687 = vmatpush1.bf16.msra.mxu1 %v1301_v3  ;;  %647 = vmatprep.subr.bf16.mxu0 %v1302_v4  ;;  %v1310_v9 = vld [vmem:[%s1922_s1 + $0x50] ss:$8 sps:$4 sm:$0xff]   ;;  %v1311_v10 = vld [vmem:[%s1922_s1 + $0x154] ss:$8 sps:$4 sm:$0xff]   ;;  %v1314_v11 = vld [vmem:[%s1922_s1 + $0x44] ss:$8 sps:$4 sm:$0xff]  }
   0x5   :  { %688 = vmatprep.subr.bf16.mxu1 %v1305_v6  ;;  %v1313_v12 = vld [vmem:[%s1922_s1 + $0x150] ss:$8 sps:$4 sm:$0xff]   ;;  %v1317_v13 = vld [vmem:[%s1922_s1 + $0x144] ss:$8 sps:$4 sm:$0xff]   ;;  %v1316_v14 = vld [vmem:[%s1922_s1 + $0x40] ss:$8 sps:$4 sm:$0xff]  }
   0x6   :  { %v1320_v15 = vld [vmem:[%s1922_s1 + $0x34] ss:$8 sps:$4 sm:$0xff]   ;;  %v1319_v16 = vld [vmem:[%s1922_s1 + $0x140] ss:$8 sps:$4 sm:$0xff]   ;;  %v1322_v18 = vld [vmem:[%s1922_s1 + $0x30] ss:$8 sps:$4 sm:$0xff]  }
   0x7   :  { %648 = vmatpush1.bf16.msra.mxu0 %v1304_v5  ;;  %v1323_v17 = vld [vmem:[%s1922_s1 + $0x134] ss:$8 sps:$4 sm:$0xff]   ;;  %v1326_v19 = vld [vmem:[%s1922_s1 + $0x24] ss:$8 sps:$4 sm:$0xff]   ;;  %v1325_v20 = vld [vmem:[%s1922_s1 + $0x130] ss:$8 sps:$4 sm:$0xff]  }
   0x8   :  { %649 = vmatprep.subr.bf16.mxu0 %v1308_v8  ;;  %689 = vmatpush1.bf16.msra.mxu1 %v1307_v7  ;;  %v1329_v21 = vld [vmem:[%s1922_s1 + $0x124] ss:$8 sps:$4 sm:$0xff]   ;;  %v1328_v22 = vld [vmem:[%s1922_s1 + $0x20] ss:$8 sps:$4 sm:$0xff]   ;;  %v1332_v23 = vld [vmem:[%s1922_s1 + $0x14] ss:$8 sps:$4 sm:$0xff]  }
   0x9   :  { %690 = vmatprep.subr.bf16.mxu1 %v1311_v10  ;;  %v1331_v24 = vld [vmem:[%s1922_s1 + $0x120] ss:$8 sps:$4 sm:$0xff]   ;;  %v1335_v25 = vld [vmem:[%s1922_s1 + $0x114] ss:$8 sps:$4 sm:$0xff]   ;;  %v1334_v26 = vld [vmem:[%s1922_s1 + $0x10] ss:$8 sps:$4 sm:$0xff]  }
   0xa   :  { %v1338_v27 = vld [vmem:[%s1922_s1 + $0x4] ss:$8 sps:$4 sm:$0xff]   ;;  %v1337_v28 = vld [vmem:[%s1922_s1 + $0x110] ss:$8 sps:$4 sm:$0xff]   ;;  %v1340_v30 = vld [vmem:[%s1922_s1] ss:$8 sps:$4 sm:$0xff]  }
   0xb   :  { %650 = vmatpush1.bf16.msra.mxu0 %v1310_v9  ;;  %v1341_v29 = vld [vmem:[%s1922_s1 + $0x104] ss:$8 sps:$4 sm:$0xff]   ;;  %v1344_v31 = vld [vmem:[%s1922_s1 + $0xf4] ss:$8 sps:$4 sm:$0xff]   ;;  %v1343_v32 = vld [vmem:[%s1922_s1 + $0x100] ss:$8 sps:$4 sm:$0xff]  }
   0xc   :  { %651 = vmatprep.subr.bf16.mxu0 %v1314_v11  ;;  %691 = vmatpush1.bf16.msra.mxu1 %v1313_v12  ;;  %v1347_v33 = vld [vmem:[%s1922_s1 + $0x1f4] ss:$8 sps:$4 sm:$0xff]   ;;  %v1346_v34 = vld [vmem:[%s1922_s1 + $0xf0] ss:$8 sps:$4 sm:$0xff]   ;;  %v1350_v35 = vld [vmem:[%s1922_s1 + $0xe4] ss:$8 sps:$4 sm:$0xff]  }
   0xd   :  { %692 = vmatprep.subr.bf16.mxu1 %v1317_v13  ;;  %v1349_v36 = vld [vmem:[%s1922_s1 + $0x1f0] ss:$8 sps:$4 sm:$0xff]   ;;  %v1353_v37 = vld [vmem:[%s1922_s1 + $0x1e4] ss:$8 sps:$4 sm:$0xff]   ;;  %v1352_v38 = vld [vmem:[%s1922_s1 + $0xe0] ss:$8 sps:$4 sm:$0xff]  }
   0xe   :  { %v1356_v39 = vld [vmem:[%s1922_s1 + $0xd4] ss:$8 sps:$4 sm:$0xff]   ;;  %v1355_v40 = vld [vmem:[%s1922_s1 + $0x1e0] ss:$8 sps:$4 sm:$0xff]   ;;  %v1358_v42 = vld [vmem:[%s1922_s1 + $0xd0] ss:$8 sps:$4 sm:$0xff]  }
   0xf   :  { %652 = vmatpush1.bf16.msra.mxu0 %v1316_v14  ;;  %v1359_v41 = vld [vmem:[%s1922_s1 + $0x1d4] ss:$8 sps:$4 sm:$0xff]   ;;  %v1362_v43 = vld [vmem:[%s1922_s1 + $0xc4] ss:$8 sps:$4 sm:$0xff]   ;;  %v1361_v44 = vld [vmem:[%s1922_s1 + $0x1d0] ss:$8 sps:$4 sm:$0xff]  }
  0x10   :  { %653 = vmatprep.subr.bf16.mxu0 %v1320_v15  ;;  %693 = vmatpush1.bf16.msra.mxu1 %v1319_v16  ;;  %v1365_v45 = vld [vmem:[%s1922_s1 + $0x1c4] ss:$8 sps:$4 sm:$0xff]   ;;  %v1364_v47 = vld [vmem:[%s1922_s1 + $0xc0] ss:$8 sps:$4 sm:$0xff]   ;;  %v1368_v49 = vld [vmem:[%s1922_s1 + $0xb4] ss:$8 sps:$4 sm:$0xff]  }
  0x11   :  { %694 = vmatprep.subr.bf16.mxu1 %v1323_v17  ;;  %v28_v46 = vld [vmem:[%s1923_s0 + $0x8] sm:$0xff]  ;;  %v30_v50 = vld [vmem:[%s1923_s0 + $0x18] sm:$0xff]  ;;  %v27_v4 = vld [vmem:[%s1923_s0] sm:$0xff]  ;;  %v1471_v17 = vmov 0  }
  0x12   :  { %v35_v48 = vpack.c.bf16 %v28_v46, %v28_v46  ;;  %v1367_v51 = vld [vmem:[%s1922_s1 + $0x1c0] ss:$8 sps:$4 sm:$0xff]   ;;  %v37_v52 = vpack.c.bf16 %v30_v50, %v30_v50  ;;  %v1371_v53 = vld [vmem:[%s1922_s1 + $0x1b4] ss:$8 sps:$4 sm:$0xff]   ;;  %v1370_v54 = vld [vmem:[%s1922_s1 + $0xb0] ss:$8 sps:$4 sm:$0xff]   ;;  %v34_v7 = vpack.c.bf16 %v27_v4, %v27_v4 }
  0x13   :  { %654 = vmatpush1.bf16.msra.mxu0 %v1322_v18  ;;  %v1374_v55 = vld [vmem:[%s1922_s1 + $0xa4] ss:$8 sps:$4 sm:$0xff]   ;;  %v1373_v56 = vld [vmem:[%s1922_s1 + $0x1b0] ss:$8 sps:$4 sm:$0xff]   ;;  %v1376_v58 = vld [vmem:[%s1922_s1 + $0xa0] ss:$8 sps:$4 sm:$0xff]  }
  0x14   :  { %655 = vmatprep.subr.bf16.mxu0 %v1326_v19  ;;  %695 = vmatpush1.bf16.msra.mxu1 %v1325_v20  ;;  %v1377_v57 = vld [vmem:[%s1922_s1 + $0x1a4] ss:$8 sps:$4 sm:$0xff]   ;;  %v1380_v59 = vld [vmem:[%s1922_s1 + $0x94] ss:$8 sps:$4 sm:$0xff]   ;;  %v1379_v60 = vld [vmem:[%s1922_s1 + $0x1a0] ss:$8 sps:$4 sm:$0xff]  }
  0x15   :  { %696 = vmatprep.subr.bf16.mxu1 %v1329_v21  ;;  %677 = vmatprep.mubr.bf16.mxu0 %v35_v48  ;;  %v1383_v61 = vld [vmem:[%s1922_s1 + $0x194] ss:$8 sps:$4 sm:$0xff]   ;;  %v1382_v62 = vld [vmem:[%s1922_s1 + $0x90] ss:$8 sps:$4 sm:$0xff]   ;;  %v1386_v63 = vld [vmem:[%s1922_s1 + $0x84] ss:$8 sps:$4 sm:$0xff]  }
  0x16   :  { %718 = vmatprep.mubr.bf16.mxu1 %v37_v52  ;;  %v1385_v0 = vld [vmem:[%s1922_s1 + $0x190] ss:$8 sps:$4 sm:$0xff]   ;;  %v1388_v1 = vld [vmem:[%s1922_s1 + $0x80] ss:$8 sps:$4 sm:$0xff]   ;;  %v1389_v2 = vld [vmem:[%s1922_s1 + $0x184] ss:$8 sps:$4 sm:$0xff]  }
  0x17   :  { %656 = vmatpush1.bf16.msra.mxu0 %v1328_v22  ;;  %v1391_v3 = vld [vmem:[%s1922_s1 + $0x180] ss:$8 sps:$4 sm:$0xff]   ;;  %v1394_v5 = vld [vmem:[%s1922_s1 + $0x274] ss:$8 sps:$4 sm:$0xff]   ;;  %v1392_v8 = vld [vmem:[%s1922_s1 + $0x270] ss:$8 sps:$4 sm:$0xff]  }
  0x18   :  { %657 = vmatprep.subr.bf16.mxu0 %v1332_v23  ;;  %697 = vmatpush1.bf16.msra.mxu1 %v1331_v24  ;;  %v29_v6 = vld [vmem:[%s1923_s0 + $0x10] sm:$0xff]  ;;  %v1397_v9 = vld [vmem:[%s1922_s1 + $0x264] ss:$8 sps:$4 sm:$0xff]   ;;  %v1437_v11 = vld [vmem:[%s1922_s1 + $0x300] ss:$8 sps:$4 sm:$0xff]  }
  0x19   :  { %698 = vmatprep.subr.bf16.mxu1 %v1335_v25  ;;  %v36_v10 = vpack.c.bf16 %v29_v6, %v29_v6  ;;  %v1439_v12 = vld [vmem:[%s1922_s1 + $0x304] ss:$8 sps:$4 sm:$0xff]   ;;  %v1395_v13 = vld [vmem:[%s1922_s1 + $0x260] ss:$8 sps:$4 sm:$0xff]   ;;  %v1400_v15 = vld [vmem:[%s1922_s1 + $0x254] ss:$8 sps:$4 sm:$0xff]  }
  0x1a   :  { %v32_v14 = vld [vmem:[%s1923_s0 + $0x28] sm:$0xff]  ;;  %v33_v18 = vld [vmem:[%s1923_s0 + $0x30] sm:$0xff]  ;;  %v1444_v50 = vld [vmem:[%s1924_s3 + $0x38] sm:$0xff]  }
  0x1b   :  { %658 = vmatpush1.bf16.msra.mxu0 %v1334_v26  ;;  %v39_v16 = vpack.c.bf16 %v32_v14, %v32_v14  ;;  %v1398_v19 = vld [vmem:[%s1922_s1 + $0x250] ss:$8 sps:$4 sm:$0xff]   ;;  %v1403_v20 = vld [vmem:[%s1922_s1 + $0x244] ss:$8 sps:$4 sm:$0xff]   ;;  %v40_v21 = vpack.c.bf16 %v33_v18, %v33_v18  ;;  %v1401_v22 = vld [vmem:[%s1922_s1 + $0x240] ss:$8 sps:$4 sm:$0xff]   ;;  %v141_v14 = vlaneseq }
  0x1c   :  { %659 = vmatprep.subr.bf16.mxu0 %v1338_v27  ;;  %699 = vmatpush1.bf16.msra.mxu1 %v1337_v28  ;;  %v1406_v23 = vld [vmem:[%s1922_s1 + $0x234] ss:$8 sps:$4 sm:$0xff]   ;;  %v1404_v24 = vld [vmem:[%s1922_s1 + $0x230] ss:$8 sps:$4 sm:$0xff]   ;;  %v1409_v25 = vld [vmem:[%s1922_s1 + $0x224] ss:$8 sps:$4 sm:$0xff]  }
  0x1d   :  { %700 = vmatprep.subr.bf16.mxu1 %v1341_v29  ;;  %v1407_v26 = vld [vmem:[%s1922_s1 + $0x220] ss:$8 sps:$4 sm:$0xff]   ;;  %v1412_v27 = vld [vmem:[%s1922_s1 + $0x214] ss:$8 sps:$4 sm:$0xff]   ;;  %v1410_v28 = vld [vmem:[%s1922_s1 + $0x210] ss:$8 sps:$4 sm:$0xff]  }
  0x1e   :  { %v1415_v29 = vld [vmem:[%s1922_s1 + $0x204] ss:$8 sps:$4 sm:$0xff]   ;;  %v1440_v46 = vld [vmem:[%s1922_s1 + $0x280] ss:$8 sps:$4 sm:$0xff]   ;;  %v1446_v52 = vld [vmem:[%s1924_s3 + $0x30] sm:$0xff]  }
  0x1f   :  { %660 = vmatpush1.bf16.msra.mxu0 %v1340_v30  ;;  %v1413_v30 = vld [vmem:[%s1922_s1 + $0x200] ss:$8 sps:$4 sm:$0xff]  }
  0x20   :  { %661 = vmatprep.subr.bf16.mxu0 %v1344_v31  ;;  %701 = vmatpush1.bf16.msra.mxu1 %v1343_v32  ;;  %v1418_v31 = vld [vmem:[%s1922_s1 + $0x2f4] ss:$8 sps:$4 sm:$0xff]   ;;  %v1416_v32 = vld [vmem:[%s1922_s1 + $0x2f0] ss:$8 sps:$4 sm:$0xff]  }
  0x21   :  { %702 = vmatprep.subr.bf16.mxu1 %v1347_v33  ;;  %v1421_v33 = vld [vmem:[%s1922_s1 + $0x2e4] ss:$8 sps:$4 sm:$0xff]  }
  0x23   :  { %662 = vmatpush2.bf16.msra.mxu0 %v1346_v34  ;;  %v1419_v34 = vld [vmem:[%s1922_s1 + $0x2e0] ss:$8 sps:$4 sm:$0xff]  }
  0x24   :  { %663 = vmatprep.subr.bf16.mxu0 %v1350_v35  ;;  %703 = vmatpush2.bf16.msra.mxu1 %v1349_v36  ;;  %v1424_v35 = vld [vmem:[%s1922_s1 + $0x2d4] ss:$8 sps:$4 sm:$0xff]   ;;  %v1422_v36 = vld [vmem:[%s1922_s1 + $0x2d0] ss:$8 sps:$4 sm:$0xff]  }
  0x25   :  { %704 = vmatprep.subr.bf16.mxu1 %v1353_v37  ;;  %v1427_v37 = vld [vmem:[%s1922_s1 + $0x2c4] ss:$8 sps:$4 sm:$0xff]  }
  0x27   :  { %664 = vmatpush2.bf16.msra.mxu0 %v1352_v38  ;;  %v1425_v38 = vld [vmem:[%s1922_s1 + $0x2c0] ss:$8 sps:$4 sm:$0xff]  }
  0x28   :  { %665 = vmatprep.subr.bf16.mxu0 %v1356_v39  ;;  %705 = vmatpush2.bf16.msra.mxu1 %v1355_v40  ;;  %v1430_v39 = vld [vmem:[%s1922_s1 + $0x2b4] ss:$8 sps:$4 sm:$0xff]   ;;  %v1428_v40 = vld [vmem:[%s1922_s1 + $0x2b0] ss:$8 sps:$4 sm:$0xff]  }
  0x29   :  { %706 = vmatprep.subr.bf16.mxu1 %v1359_v41  ;;  %v1433_v41 = vld [vmem:[%s1922_s1 + $0x2a4] ss:$8 sps:$4 sm:$0xff]  }
  0x2b   :  { %666 = vmatpush2.bf16.msra.mxu0 %v1358_v42  ;;  %v1431_v42 = vld [vmem:[%s1922_s1 + $0x2a0] ss:$8 sps:$4 sm:$0xff]  }
  0x2c   :  { %667 = vmatprep.subr.bf16.mxu0 %v1362_v43  ;;  %707 = vmatpush2.bf16.msra.mxu1 %v1361_v44  ;;  %v1436_v43 = vld [vmem:[%s1922_s1 + $0x294] ss:$8 sps:$4 sm:$0xff]   ;;  %v1434_v44 = vld [vmem:[%s1922_s1 + $0x290] ss:$8 sps:$4 sm:$0xff]  }
  0x2d   :  { %708 = vmatprep.subr.bf16.mxu1 %v1365_v45  ;;  %v1442_v45 = vld [vmem:[%s1922_s1 + $0x284] ss:$8 sps:$4 sm:$0xff]  }
  0x2f   :  { %668 = vmatpush2.bf16.msra.mxu0 %v1364_v47  ;;  %v31_v47 = vld [vmem:[%s1923_s0 + $0x20] sm:$0xff] }
  0x30   :  { %669 = vmatprep.subr.bf16.mxu0 %v1368_v49  ;;  %709 = vmatpush2.bf16.msra.mxu1 %v1367_v51  ;;  %v38_v48 = vpack.c.bf16 %v31_v47, %v31_v47  ;;  %v1443_v49 = vld [vmem:[%s1924_s3 + $0x78] sm:$0xff]   ;;  %v1445_v51 = vld [vmem:[%s1924_s3 + $0x70] sm:$0xff]  }
  0x31   :  { %710 = vmatprep.subr.bf16.mxu1 %v1371_v53  ;;  %v1447_v53 = vld [vmem:[%s1924_s3 + $0x68] sm:$0xff]  }
  0x33   :  { %670 = vmatpush2.bf16.msra.mxu0 %v1370_v54  ;;  %v1448_v54 = vld [vmem:[%s1924_s3 + $0x28] sm:$0xff]  }
  0x34   :  { %671 = vmatprep.subr.bf16.mxu0 %v1374_v55  ;;  %711 = vmatpush2.bf16.msra.mxu1 %v1373_v56  ;;  %v1449_v55 = vld [vmem:[%s1924_s3 + $0x60] sm:$0xff]  }
  0x35   :  { %712 = vmatprep.subr.bf16.mxu1 %v1377_v57  ;;  %v1450_v56 = vld [vmem:[%s1924_s3 + $0x20] sm:$0xff]   ;;  %v1451_v57 = vld [vmem:[%s1924_s3 + $0x58] sm:$0xff]  }
  0x37   :  { %672 = vmatpush2.bf16.msra.mxu0 %v1376_v58  ;;  %v1452_v58 = vld [vmem:[%s1924_s3 + $0x18] sm:$0xff]  }
  0x38   :  { %673 = vmatprep.subr.bf16.mxu0 %v1380_v59  ;;  %713 = vmatpush2.bf16.msra.mxu1 %v1379_v60  ;;  %v1453_v59 = vld [vmem:[%s1924_s3 + $0x50] sm:$0xff]  }
  0x39   :  { %714 = vmatprep.subr.bf16.mxu1 %v1383_v61  ;;  %v1454_v60 = vld [vmem:[%s1924_s3 + $0x10] sm:$0xff]   ;;  %v1455_v61 = vld [vmem:[%s1924_s3 + $0x48] sm:$0xff]  }
  0x3b   :  { %674 = vmatpush2.bf16.msra.mxu0 %v1382_v62  ;;  %v1456_v62 = vld [vmem:[%s1924_s3 + $0x8] sm:$0xff]  }
  0x3c   :  { %675 = vmatprep.subr.bf16.mxu0 %v1386_v63  ;;  %715 = vmatpush2.bf16.msra.mxu1 %v1385_v0  ;;  %v1457_v63 = vld [vmem:[%s1924_s3 + $0x40] sm:$0xff]  }
  0x3d   :  { %716 = vmatprep.subr.bf16.mxu1 %v1389_v2  ;;  %v1458_v0 = vld [vmem:[%s1924_s3] sm:$0xff]  }
  0x3f   :  { %676 = vmatpush2.bf16.msra.mxu0 %v1388_v1  ;;  %v1472_v1 = vmov 0.0  }
  0x40   :  { %727 = vmatprep.subr.bf16.mxu0 %v1394_v5  ;;  %717 = vmatpush2.bf16.msra.mxu1 %v1391_v3 }
  0x41   :  { %782 = vmatprep.subr.bf16.mxu1 %v1439_v12 }
  0x42   :  { %678 = vmatmul.mubr.bf16.vlgmr.msra.gmra.mxu0 %v34_v7 }
  0x43   :  { %728 = vmatpush1.bf16.msra.mxu0 %v1392_v8  ;;  %719 = vmatmul.mubr.bf16.vlgmr.msra.gmra.mxu1 %v36_v10 }
  0x44   :  { %729 = vmatprep.subr.bf16.mxu0 %v1397_v9  ;;  %783 = vmatpush1.bf16.msra.mxu1 %v1437_v11 }
  0x45   :  { %800 = vmatprep.mubr.bf16.mxu1 %v1471_v17  ;;  %759 = vmatprep.mubr.bf16.mxu0 %v39_v16  ;;  %v139_v17 = vld [vmem:[%s1926_s2] sm:$0x3] }
  0x46   :  { %1242 = vmatprep.subr.bf16.mxu1 %v1443_v49 }
  0x47   :  { %730 = vmatpush1.bf16.msra.mxu0 %v1395_v13 }
  0x48   :  { %731 = vmatprep.subr.bf16.mxu0 %v1400_v15  ;;  %v142_v15 = vshrl.u32 %v141_v14, 7 }
  0x4a   :  { %v143_v16 = vsub.s32 0, %v142_v15  ;;  %v147_v18 = vsub.s32 1, %v142_v15 }
  0x4b   :  { %732 = vmatpush1.bf16.msra.mxu0 %v1398_v19  ;;  %1215 = vmatmul.mubr.msk.bf16.vlgmr.msra.gmra.mxu1 %vm641_vm0, %v40_v21 }
  0x4c   :  { %733 = vmatprep.subr.bf16.mxu0 %v1403_v20  ;;  %1243 = vmatpush3.bf16.msra.mxu1 %v1444_v50  ;;  %v144_v19 = vrot.slane %v139_v17, %v143_v16  ;;  %v148_v20 = vrot.slane %v139_v17, %v147_v18 }
  0x4d   :  { %1244 = vmatprep.subr.bf16.mxu1 %v1445_v51 }
  0x4f   :  { %734 = vmatpush1.bf16.msra.mxu0 %v1401_v22 }
  0x50   :  { %735 = vmatprep.subr.bf16.mxu0 %v1406_v23  ;;  %1245 = vmatpush3.bf16.msra.mxu1 %v1446_v52 }
  0x51   :  { %1246 = vmatprep.subr.bf16.mxu1 %v1447_v53 }
  0x53   :  { %736 = vmatpush1.bf16.msra.mxu0 %v1404_v24 }
  0x54   :  { %737 = vmatprep.subr.bf16.mxu0 %v1409_v25  ;;  %1247 = vmatpush3.bf16.msra.mxu1 %v1448_v54  ;;  %v1233_v54 = vld [vmem:[%s1928_s6] ss:$0 sm:$0xff] }
  0x55   :  { %1248 = vmatprep.subr.bf16.mxu1 %v1449_v55 }
  0x57   :  { %738 = vmatpush1.bf16.msra.mxu0 %v1407_v26 }
  0x58   :  { %739 = vmatprep.subr.bf16.mxu0 %v1412_v27  ;;  %1249 = vmatpush3.bf16.msra.mxu1 %v1450_v56 }
  0x59   :  { %1250 = vmatprep.subr.bf16.mxu1 %v1451_v57 }
  0x5b   :  { %740 = vmatpush1.bf16.msra.mxu0 %v1410_v28 }
  0x5c   :  { %741 = vmatprep.subr.bf16.mxu0 %v1415_v29  ;;  %1251 = vmatpush3.bf16.msra.mxu1 %v1452_v58 }
  0x5d   :  { %1252 = vmatprep.subr.bf16.mxu1 %v1453_v59 }
  0x5f   :  { %742 = vmatpush1.bf16.msra.mxu0 %v1413_v30 }
  0x60   :  { %743 = vmatprep.subr.bf16.mxu0 %v1418_v31  ;;  %1253 = vmatpush3.bf16.msra.mxu1 %v1454_v60 }
  0x61   :  { %1254 = vmatprep.subr.bf16.mxu1 %v1455_v61 }
  0x63   :  { %744 = vmatpush2.bf16.msra.mxu0 %v1416_v32 }
  0x64   :  { %745 = vmatprep.subr.bf16.mxu0 %v1421_v33  ;;  %1255 = vmatpush3.bf16.msra.mxu1 %v1456_v62 }
  0x65   :  { %1256 = vmatprep.subr.bf16.mxu1 %v1457_v63 }
  0x67   :  { %746 = vmatpush2.bf16.msra.mxu0 %v1419_v34 }
  0x68   :  { %747 = vmatprep.subr.bf16.mxu0 %v1424_v35  ;;  %1257 = vmatpush3.bf16.msra.mxu1 %v1458_v0 }
  0x69   :  { %1273 = vmatprep.subr.bf16.mxu1 %v1472_v1 }
  0x6b   :  { %748 = vmatpush2.bf16.msra.mxu0 %v1422_v36  ;;  %v1459_v36 = vld [vmem:[%s1925_s5 + $0x38] sm:$0xff]  }
  0x6c   :  { %749 = vmatprep.subr.bf16.mxu0 %v1427_v37 }
  0x6f   :  { %750 = vmatpush2.bf16.msra.mxu0 %v1425_v38  ;;  %v1460_v38 = vld [vmem:[%s1925_s5 + $0x30] sm:$0xff]  }
  0x70   :  { %751 = vmatprep.subr.bf16.mxu0 %v1430_v39  ;;  %v1461_v39 = vld [vmem:[%s1925_s5 + $0x28] sm:$0xff]  }
  0x73   :  { %752 = vmatpush2.bf16.msra.mxu0 %v1428_v40  ;;  %v1462_v40 = vld [vmem:[%s1925_s5 + $0x20] sm:$0xff]  }
  0x74   :  { %753 = vmatprep.subr.bf16.mxu0 %v1433_v41  ;;  %v1463_v41 = vld [vmem:[%s1925_s5 + $0x18] sm:$0xff]  }
  0x77   :  { %754 = vmatpush2.bf16.msra.mxu0 %v1431_v42  ;;  %v1464_v42 = vld [vmem:[%s1925_s5 + $0x10] sm:$0xff]  }
  0x78   :  { %755 = vmatprep.subr.bf16.mxu0 %v1436_v43  ;;  %v1465_v43 = vld [vmem:[%s1925_s5 + $0x8] sm:$0xff]  }
  0x7b   :  { %756 = vmatpush2.bf16.msra.mxu0 %v1434_v44  ;;  %v1466_v44 = vld [vmem:[%s1925_s5] sm:$0xff]  }
  0x7c   :  { %757 = vmatprep.subr.bf16.mxu0 %v1442_v45 }
  0x7f   :  { %758 = vmatpush2.bf16.msra.mxu0 %v1440_v46  ;;  %v1216_v46 = vld [vmem:[%s1927_s4] ss:$0 sm:$0xff] }
  0x82   :  { %760 = vmatmul.mubr.bf16.vlgmr.msra.gmra.mxu0 %v38_v48 }
 0x102   :  { %v679_v2 = vpop.f32.mrf.mxu0 }
 0x103   :  { %v720_v4 = vpop.f32.mrf.mxu1  ;;  %v680_v21 = vadd.f32 %v679_v2, %v144_v19 }
 0x104   :  { %v681_v3 = vpop.f32.mrf.mxu0 }
 0x105   :  { %v722_v6 = vpop.f32.mrf.mxu1  ;;  %v682_v22 = vadd.f32 %v681_v3, %v148_v20  ;;  %v721_v23 = vadd.f32 %v720_v4, %v680_v21 }
 0x106   :  { %v683_v5 = vpop.f32.mrf.mxu0 }
 0x107   :  { %v724_v8 = vpop.f32.mrf.mxu1  ;;  %v723_v25 = vadd.f32 %v722_v6, %v682_v22 }
 0x108   :  { %v684_v7 = vpop.f32.mrf.mxu0 }
 0x109   :  { %v725_v9 = vpop.f32.mrf.mxu1 }
 0x10b   :  { %v802_v10 = vpop.f32.mrf.mxu1 }
 0x10d   :  { %v804_v11 = vpop.f32.mrf.mxu1 }
 0x10f   :  { %v806_v12 = vpop.f32.mrf.mxu1 }
 0x111   :  { %v807_v13 = vpop.f32.mrf.mxu1 }
 0x142   :  { %v761_v24 = vpop.f32.mrf.mxu0 }
 0x143   :  { %v762_v26 = vadd.f32 %v761_v24, %v721_v23 }
 0x144   :  { %v763_v27 = vpop.f32.mrf.mxu0 }
 0x145   :  { %v803_v28 = vadd.f32 %v802_v10, %v762_v26  ;;  %v764_v29 = vadd.f32 %v763_v27, %v723_v25 }
 0x146   :  { %v765_v30 = vpop.f32.mrf.mxu0 }
 0x147   :  { %v805_v31 = vadd.f32 %v804_v11, %v764_v29  ;;  %v809_v32 = vmax.f32 %v803_v28, 0.0 }
 0x148   :  { %v766_v33 = vpop.f32.mrf.mxu0 }
 0x149   :  { %v810_v34 = vmax.f32 %v805_v31, 0.0  ;;  %v811_v37 = vpack.c.bf16 %v809_v32, %v809_v32 }
 0x14b   :  { %v812_v35 = vpack.c.bf16 %v810_v34, %v810_v34 }
 0x14d   :  { %980 = vmatprep.mubr.bf16.mxu1 %v812_v35 }
 0x14e   :  { %981 = vmatmul.mubr.bf16.vlgmr.msra.gmra.mxu1 %v811_v37 }
 0x14f   :  { %1274 = vmatpush3.bf16.msra.mxu1 %v1459_v36  ;;  %1289 = vmatprep.mubr.msk.bf16.mxu1 %vm1473_vm1, %v1472_v1 }
 0x150   :  { %1275 = vmatprep.subr.bf16.mxu1 %v1472_v1 }
 0x153   :  { %1276 = vmatpush3.bf16.msra.mxu1 %v1460_v38 }
 0x154   :  { %1277 = vmatprep.subr.bf16.mxu1 %v1472_v1 }
 0x157   :  { %1278 = vmatpush3.bf16.msra.mxu1 %v1461_v39 }
 0x158   :  { %1279 = vmatprep.subr.bf16.mxu1 %v1472_v1 }
 0x15b   :  { %1280 = vmatpush3.bf16.msra.mxu1 %v1462_v40 }
 0x15c   :  { %1281 = vmatprep.subr.bf16.mxu1 %v1472_v1 }
 0x15f   :  { %1282 = vmatpush3.bf16.msra.mxu1 %v1463_v41 }
 0x160   :  { %1283 = vmatprep.subr.bf16.mxu1 %v1472_v1 }
 0x163   :  { %1284 = vmatpush3.bf16.msra.mxu1 %v1464_v42 }
 0x164   :  { %1285 = vmatprep.subr.bf16.mxu1 %v1472_v1 }
 0x167   :  { %1286 = vmatpush3.bf16.msra.mxu1 %v1465_v43 }
 0x168   :  { %1287 = vmatprep.subr.bf16.mxu1 %v1472_v1 }
 0x16b   :  { %1288 = vmatpush3.bf16.msra.mxu1 %v1466_v44 }
 0x20e   :  { %v1258_v45 = vpop.f32.mrf.mxu1 }
 0x210   :  { %v1259_v47 = vpop.f32.mrf.mxu1 }
 0x211   :  { %v1260_v48 = vadd.f32 %v1259_v47, %v1258_v45 }
 0x212   :  { %v1261_v49 = vpop.f32.mrf.mxu1 }
 0x213   :  { %v983_v50 = vadd.f32 %v1260_v48, %v1216_v46 }
 0x214   :  { %v1262_v51 = vpop.f32.mrf.mxu1 }
 0x215   :  { %v988_v52 = vmax.f32 %v983_v50, 0.0 }
 0x217   :  { %v989_v53 = vpack.c.bf16 %v988_v52, %v988_v52 }
 0x219   :  { %1290 = vmatmul.mubr.bf16.vlgmr.msra.gmra.mxu1 %v989_v53 }
 0x2d9   :  { %v1095_v55 = vpop.f32.mrf.mxu1 }
 0x2da   :  { %v1096_v56 = vadd.f32 %v1233_v54, %v1095_v55 }
 0x2db   :  { %v1291_v57 = vpop.f32.mrf.mxu1 }
 0x2dc   :  { %1101 = vmax.xlane.f32.xlu0 %v1096_v56 }
 0x2dd   :  { %v1098_v58 = vpop.f32.mrf.mxu1 }
 0x2df   :  { %v1292_v59 = vpop.f32.mrf.mxu1 }
 0x365   :  { %v1102_v60 = vpop.xlane.xlu0 %1101 }
 0x366   :  { %v1103_v61 = vsub.f32 %v1096_v56, %v1102_v60 }
 0x368   :  { %v1104_v62 = vmul.f32 1.442695, %v1103_v61 }
 0x36a   :  { %1467 = vpow2.f32 %v1104_v62 }
 0x377   :  { %v1468_v63 = vpop.eup %1467 }
 0x378   :  { %1106 = vadd.xlane.f32.xlu0 %v1468_v63 }
 0x401   :  { %v1107_v0 = vpop.xlane.xlu0 %1106 }
 0x402   :  { %1469 = vlog2.f32 %v1107_v0 }
 0x40f   :  { %v1470_v1 = vpop.eup %1469 }
 0x410   :  { %v1109_v2 = vmul.f32 0.6931472, %v1470_v1 }
 0x412   :  { %v1110_v3 = vsub.f32 %v1103_v61, %v1109_v2 }
 0x414   :  { %v1111_v4 = vpack.c.bf16 %v1110_v3, %v1110_v3 }
 0x416   :  { %1112 = vst [vmem:[%s1929_s7] sm:$0xf] %v1111_v4 }

</bundles_post_ra>
